<compile_context>
chip_gen: v7x
topology: tpu7x:2x2x1
jax: 0.10.0
libtpu: 0.0.40
codegen_flags: <defaults>
</compile_context>

<pallas_src>
import functools
from copy import deepcopy

import jax
import jax.numpy as jnp
import numpy as np
from jax import lax
from jax.experimental import pallas as pl
from jax.experimental.pallas import tpu as pltpu

# --- tuning constants (conservative: fit v7x's 64 MiB VMEM as well as v5e/v6e) ---
_PER_OUT_BUF_BYTES = 16 * 1024 * 1024   # one output tile buffer (Pallas double-buffers it)
_TABLE_VMEM_BYTES = 8 * 1024 * 1024     # budget (x2 buffers) for the VMEM-resident fast path
_VMEM_LIMIT_CAP = 48 * 1024 * 1024      # scoped VMEM limit we request (< v7x 64 MiB physical)
_MAX_TOKEN_TILE = 1024                  # cap on in-flight row DMAs per grid step
_MAX_TOKENS_PER_CALL = 16384            # keeps the scalar-prefetch SMEM footprint <= 64 KiB


def _gather_kernel(ids_ref, emb_ref, out_ref, sem, *, token_tile):
    """Gather `token_tile` embedding rows into the current output tile.

    ids_ref : (n_padded,) int32 SMEM  -- scalar-prefetched flat token ids
    emb_ref : (V, D)                  -- table; raw HBM ref (memory_space=ANY) for large
                                         vocabularies, resident VMEM block for small ones
    out_ref : (token_tile, D) VMEM output tile
    sem     : (1,) DMA semaphore scratch
    """
    base = pl.program_id(0) * token_tile

    def issue(t):
        row = ids_ref[base + t]
        pltpu.make_async_copy(
            emb_ref.at[pl.ds(row, 1), :],   # (1, D) table row
            out_ref.at[pl.ds(t, 1), :],     # (1, D) row of the output tile
            sem.at[0],
        ).start()

    if token_tile <= 128:
        # Small tile: fully unroll at trace time (straight-line DMA starts).
        for t in range(token_tile):
            issue(t)
    else:
        def body(t, carry):
            issue(t)
            return carry
        lax.fori_loop(0, token_tile, body, 0, unroll=8)

    # Single aggregate drain: DMA semaphores count bytes, and the row copies above
    # transfer exactly token_tile * D * itemsize bytes in total, so one wait with a
    # descriptor of the full tile balances every per-row completion signal.
    pltpu.make_async_copy(out_ref, out_ref, sem.at[0]).wait()


def _pick_token_tile(n_tok, row_bytes, requested):
    if requested is not None:
        tt = int(requested)
    else:
        tt = _PER_OUT_BUF_BYTES // max(1, row_bytes)
        tt = min(_MAX_TOKEN_TILE, tt)
    tt = max(8, (tt // 8) * 8)                # sublane granule
    if tt > n_tok:                            # never exceed the chunk itself
        tt = (n_tok // 8) * 8 if n_tok >= 8 else n_tok
    return max(1, tt)


def _lookup_chunk(flat_ids, emb, token_tile):
    n_tok = int(flat_ids.shape[0])
    V, D = emb.shape
    itemsize = jnp.dtype(emb.dtype).itemsize

    tt = _pick_token_tile(n_tok, D * itemsize, token_tile)
    grid_len = pl.cdiv(n_tok, tt)
    n_padded = grid_len * tt
    if n_padded != n_tok:
        # Only the tiny id array is padded (padded ids gather row 0; those output
        # rows fall in the clipped part of the last tile and are dropped).
        flat_ids = jnp.concatenate(
            [flat_ids, jnp.zeros((n_padded - n_tok,), jnp.int32)], axis=0)

    table_bytes = V * D * itemsize
    fast_path = 2 * table_bytes <= _TABLE_VMEM_BYTES
    if fast_path:
        # Small table: keep it resident in VMEM (fetched once by the pipeline);
        # row gathers become cheap on-chip copies instead of random HBM reads.
        emb_spec = pl.BlockSpec((V, D), lambda i, ids: (0, 0))
    else:
        # Large table: stays in HBM, rows gathered by per-row DMAs.
        # TODO(synk): for large tables with tiny D (< 128 B rows), pack several
        # tokens per output row so each DMA is >= ~512 B.
        emb_spec = pl.BlockSpec(memory_space=pl.ANY)

    out_bufs = 2 * tt * D * itemsize                # double-buffered output tile
    tbl_bufs = 2 * table_bytes if fast_path else 0
    vmem_limit = int(min(max(out_bufs + tbl_bufs + (4 << 20), 16 << 20), _VMEM_LIMIT_CAP))

    kernel = functools.partial(_gather_kernel, token_tile=tt)

    return pl.pallas_call(
        kernel,
        out_shape=jax.ShapeDtypeStruct((n_tok, D), emb.dtype),
        grid_spec=pltpu.PrefetchScalarGridSpec(
            num_scalar_prefetch=1,                  # flat ids -> SMEM
            grid=(grid_len,),
            in_specs=[emb_spec],
            out_specs=pl.BlockSpec((tt, D), lambda i, ids: (i, 0)),
            scratch_shapes=[pltpu.SemaphoreType.DMA((1,))],
        ),
        compiler_params=pltpu.CompilerParams(
            dimension_semantics=("parallel",),      # independent tiles -> both TCs on v7x
            vmem_limit_bytes=vmem_limit,
        ),
        cost_estimate=pl.CostEstimate(
            flops=0,
            transcendentals=0,
            bytes_accessed=2 * int(n_tok) * int(D) * int(itemsize),  # rows read + written
        ),
    )(flat_ids, emb)


def embedding_lookup(ids: jax.Array, emb: jax.Array, *, token_tile=None) -> jax.Array:
    """Pallas equivalent of torch.nn.Embedding forward: emb[ids] (exact gather)."""
    orig_shape = ids.shape
    V, D = emb.shape
    flat = ids.reshape(-1).astype(jnp.int32)
    n_tok = int(flat.shape[0])
    if n_tok == 0:
        return jnp.zeros((*orig_shape, D), emb.dtype)

    if n_tok <= _MAX_TOKENS_PER_CALL:
        out = _lookup_chunk(flat, emb, token_tile)
    else:
        # Chunk huge id arrays so the scalar-prefetched ids never overflow SMEM
        # (1-D SMEM pads to next_pow2(4N) bytes).
        parts = []
        for s in range(0, n_tok, _MAX_TOKENS_PER_CALL):
            parts.append(_lookup_chunk(flat[s:s + _MAX_TOKENS_PER_CALL], emb, token_tile))
        out = jnp.concatenate(parts, axis=0)

    return out.reshape(*orig_shape, D)


class EmbeddingLayerJAX:
    """JAX/Pallas re-implementation of fl_sim EmbeddingLayer (forward pass)."""

    def __init__(self, embedding_matrix: np.ndarray, word2id, oov="<oov>",
                 pad="<pad>", freeze=True, *, param_dtype=jnp.float32, seed=0):
        vocab_size, embedding_dim = embedding_matrix.shape
        self.word2id = deepcopy(word2id)
        if oov not in self.word2id:
            self.word2id[oov] = len(self.word2id)
        if pad not in self.word2id:
            self.word2id[pad] = len(self.word2id)
        self.vocab_size, self.dim = len(self.word2id), embedding_dim
        self.oovid = self.word2id[oov]
        self.padid = self.word2id[pad]

        # Deterministic init: uniform(-0.25, 0.25), then copy pre-trained rows.
        key = jax.random.PRNGKey(seed)
        weight = jax.random.uniform(
            key, (self.vocab_size, self.dim), jnp.float32, -0.25, 0.25
        )
        weight = weight.at[:vocab_size].set(jnp.asarray(embedding_matrix, jnp.float32))
        # param_dtype=jnp.bfloat16 halves gather + writeback bytes (biggest relative
        # win on v5e's HBM); default stays f32 for bit-parity with torch.nn.Embedding.
        self.weight = weight.astype(param_dtype)
        # TODO(synk): `freeze` only affects training (requires_grad); forward is identical.

    def __call__(self, ids: jax.Array) -> jax.Array:
        return embedding_lookup(ids, self.weight)


if __name__ == "__main__":
    key = jax.random.PRNGKey(0)
    k_emb, k_ids, k_ids2 = jax.random.split(key, 3)

    # Small synthetic "pre-trained" matrix: 126 words + oov + pad = 128 vocab.
    n_pretrained, dim = 126, 32
    embedding_matrix = np.asarray(
        jax.random.normal(k_emb, (n_pretrained, dim), jnp.float32)
    )
    word2id = {f"word_{i}": i for i in range(n_pretrained)}

    layer = EmbeddingLayerJAX(embedding_matrix, word2id)

    # Input token ids: batch=2, seq=8 -> 16 tokens, VMEM-resident fast path, 1 tile.
    B, S = 2, 8
    ids = jax.random.randint(k_ids, (B, S), 0, layer.vocab_size, jnp.int32)
    out = jax.block_until_ready(layer(ids))

    # Reference: plain gather (bit-exact, no matmul involved).
    ref = layer.weight[ids]
    assert out.shape == (B, S, dim), out.shape
    assert out.dtype == jnp.float32
    np.testing.assert_array_equal(np.asarray(out), np.asarray(ref))

    # Odd-sized input exercises the partial last output tile (no crop copy).
    ids2 = jax.random.randint(k_ids2, (3, 5), 0, layer.vocab_size, jnp.int32)
    out2 = jax.block_until_ready(layer(ids2))
    np.testing.assert_array_equal(np.asarray(out2), np.asarray(layer.weight[ids2]))

    print("KERNEL_OK")
</pallas_src>

<mosaic_0001>
module attributes {stable_mosaic.version = 11 : i64} {
  func.func @_gather_kernel(%arg0: i32, %arg1: memref<16xi32, #tpu.memory_space<smem>>, %arg2: memref<128x32xf32, #tpu.memory_space<vmem>>, %arg3: memref<16x32xf32, #tpu.memory_space<vmem>>, %arg4: memref<1x!tpu.dma_semaphore, #tpu.memory_space<semaphore_mem>>) attributes {dimension_semantics = [#tpu.dimension_semantics<parallel>], iteration_bounds = array<i64: 1>, scalar_prefetch = 1 : i64, scratch_operands = 1 : i64, tpu.core_type = #tpu.core_type<tc>, window_params = [{pipeline_mode = #tpu.pipeline_mode<synchronous>, transform_indices = @transform_0, window_bounds = array<i64: 128, 32>}, {transform_indices = @transform_1, window_bounds = array<i64: 16, 32>}]} {
    %c16_i32 = arith.constant 16 : i32
    %0 = arith.muli %arg0, %c16_i32 : i32
    %c0_i32 = arith.constant 0 : i32
    %1 = arith.addi %0, %c0_i32 : i32
    %2 = arith.index_cast %1 : i32 to index
    %3 = memref.load %arg1[%2] : memref<16xi32, #tpu.memory_space<smem>>
    %c0_i32_0 = arith.constant 0 : i32
    %c0_i32_1 = arith.constant 0 : i32
    %4 = tpu.memref_slice %arg2[%3, %c0_i32_1] : memref<128x32xf32, #tpu.memory_space<vmem>> -> memref<1x32xf32, #tpu.memory_space<vmem>>
    %c0_i32_2 = arith.constant 0 : i32
    %c0_i32_3 = arith.constant 0 : i32
    %5 = tpu.memref_slice %arg3[%c0_i32_2, %c0_i32_3] : memref<16x32xf32, #tpu.memory_space<vmem>> -> memref<1x32xf32, #tpu.memory_space<vmem>>
    %6 = tpu.memref_slice %arg4[%c0_i32_0] : memref<1x!tpu.dma_semaphore, #tpu.memory_space<semaphore_mem>> -> memref<1x!tpu.dma_semaphore, #tpu.memory_space<semaphore_mem>>
    %7 = tpu.memref_squeeze %6 : memref<1x!tpu.dma_semaphore, #tpu.memory_space<semaphore_mem>> -> memref<!tpu.dma_semaphore, #tpu.memory_space<semaphore_mem>>
    tpu.enqueue_dma source(%4 : memref<1x32xf32, #tpu.memory_space<vmem>>) target(%5 : memref<1x32xf32, #tpu.memory_space<vmem>>) target_semaphore(%7 : memref<!tpu.dma_semaphore, #tpu.memory_space<semaphore_mem>>)
    %c1_i32 = arith.constant 1 : i32
    %8 = arith.addi %0, %c1_i32 : i32
    %9 = arith.index_cast %8 : i32 to index
    %10 = memref.load %arg1[%9] : memref<16xi32, #tpu.memory_space<smem>>
    %c0_i32_4 = arith.constant 0 : i32
    %c0_i32_5 = arith.constant 0 : i32
    %11 = tpu.memref_slice %arg2[%10, %c0_i32_5] : memref<128x32xf32, #tpu.memory_space<vmem>> -> memref<1x32xf32, #tpu.memory_space<vmem>>
    %c1_i32_6 = arith.constant 1 : i32
    %c0_i32_7 = arith.constant 0 : i32
    %12 = tpu.memref_slice %arg3[%c1_i32_6, %c0_i32_7] : memref<16x32xf32, #tpu.memory_space<vmem>> -> memref<1x32xf32, #tpu.memory_space<vmem>>
    %13 = tpu.memref_slice %arg4[%c0_i32_4] : memref<1x!tpu.dma_semaphore, #tpu.memory_space<semaphore_mem>> -> memref<1x!tpu.dma_semaphore, #tpu.memory_space<semaphore_mem>>
    %14 = tpu.memref_squeeze %13 : memref<1x!tpu.dma_semaphore, #tpu.memory_space<semaphore_mem>> -> memref<!tpu.dma_semaphore, #tpu.memory_space<semaphore_mem>>
    tpu.enqueue_dma source(%11 : memref<1x32xf32, #tpu.memory_space<vmem>>) target(%12 : memref<1x32xf32, #tpu.memory_space<vmem>>) target_semaphore(%14 : memref<!tpu.dma_semaphore, #tpu.memory_space<semaphore_mem>>)
    %c2_i32 = arith.constant 2 : i32
    %15 = arith.addi %0, %c2_i32 : i32
    %16 = arith.index_cast %15 : i32 to index
    %17 = memref.load %arg1[%16] : memref<16xi32, #tpu.memory_space<smem>>
    %c0_i32_8 = arith.constant 0 : i32
    %c0_i32_9 = arith.constant 0 : i32
    %18 = tpu.memref_slice %arg2[%17, %c0_i32_9] : memref<128x32xf32, #tpu.memory_space<vmem>> -> memref<1x32xf32, #tpu.memory_space<vmem>>
    %c2_i32_10 = arith.constant 2 : i32
    %c0_i32_11 = arith.constant 0 : i32
    %19 = tpu.memref_slice %arg3[%c2_i32_10, %c0_i32_11] : memref<16x32xf32, #tpu.memory_space<vmem>> -> memref<1x32xf32, #tpu.memory_space<vmem>>
    %20 = tpu.memref_slice %arg4[%c0_i32_8] : memref<1x!tpu.dma_semaphore, #tpu.memory_space<semaphore_mem>> -> memref<1x!tpu.dma_semaphore, #tpu.memory_space<semaphore_mem>>
    %21 = tpu.memref_squeeze %20 : memref<1x!tpu.dma_semaphore, #tpu.memory_space<semaphore_mem>> -> memref<!tpu.dma_semaphore, #tpu.memory_space<semaphore_mem>>
    tpu.enqueue_dma source(%18 : memref<1x32xf32, #tpu.memory_space<vmem>>) target(%19 : memref<1x32xf32, #tpu.memory_space<vmem>>) target_semaphore(%21 : memref<!tpu.dma_semaphore, #tpu.memory_space<semaphore_mem>>)
    %c3_i32 = arith.constant 3 : i32
    %22 = arith.addi %0, %c3_i32 : i32
    %23 = arith.index_cast %22 : i32 to index
    %24 = memref.load %arg1[%23] : memref<16xi32, #tpu.memory_space<smem>>
    %c0_i32_12 = arith.constant 0 : i32
    %c0_i32_13 = arith.constant 0 : i32
    %25 = tpu.memref_slice %arg2[%24, %c0_i32_13] : memref<128x32xf32, #tpu.memory_space<vmem>> -> memref<1x32xf32, #tpu.memory_space<vmem>>
    %c3_i32_14 = arith.constant 3 : i32
    %c0_i32_15 = arith.constant 0 : i32
    %26 = tpu.memref_slice %arg3[%c3_i32_14, %c0_i32_15] : memref<16x32xf32, #tpu.memory_space<vmem>> -> memref<1x32xf32, #tpu.memory_space<vmem>>
    %27 = tpu.memref_slice %arg4[%c0_i32_12] : memref<1x!tpu.dma_semaphore, #tpu.memory_space<semaphore_mem>> -> memref<1x!tpu.dma_semaphore, #tpu.memory_space<semaphore_mem>>
    %28 = tpu.memref_squeeze %27 : memref<1x!tpu.dma_semaphore, #tpu.memory_space<semaphore_mem>> -> memref<!tpu.dma_semaphore, #tpu.memory_space<semaphore_mem>>
    tpu.enqueue_dma source(%25 : memref<1x32xf32, #tpu.memory_space<vmem>>) target(%26 : memref<1x32xf32, #tpu.memory_space<vmem>>) target_semaphore(%28 : memref<!tpu.dma_semaphore, #tpu.memory_space<semaphore_mem>>)
    %c4_i32 = arith.constant 4 : i32
    %29 = arith.addi %0, %c4_i32 : i32
    %30 = arith.index_cast %29 : i32 to index
    %31 = memref.load %arg1[%30] : memref<16xi32, #tpu.memory_space<smem>>
    %c0_i32_16 = arith.constant 0 : i32
    %c0_i32_17 = arith.constant 0 : i32
    %32 = tpu.memref_slice %arg2[%31, %c0_i32_17] : memref<128x32xf32, #tpu.memory_space<vmem>> -> memref<1x32xf32, #tpu.memory_space<vmem>>
    %c4_i32_18 = arith.constant 4 : i32
    %c0_i32_19 = arith.constant 0 : i32
    %33 = tpu.memref_slice %arg3[%c4_i32_18, %c0_i32_19] : memref<16x32xf32, #tpu.memory_space<vmem>> -> memref<1x32xf32, #tpu.memory_space<vmem>>
    %34 = tpu.memref_slice %arg4[%c0_i32_16] : memref<1x!tpu.dma_semaphore, #tpu.memory_space<semaphore_mem>> -> memref<1x!tpu.dma_semaphore, #tpu.memory_space<semaphore_mem>>
    %35 = tpu.memref_squeeze %34 : memref<1x!tpu.dma_semaphore, #tpu.memory_space<semaphore_mem>> -> memref<!tpu.dma_semaphore, #tpu.memory_space<semaphore_mem>>
    tpu.enqueue_dma source(%32 : memref<1x32xf32, #tpu.memory_space<vmem>>) target(%33 : memref<1x32xf32, #tpu.memory_space<vmem>>) target_semaphore(%35 : memref<!tpu.dma_semaphore, #tpu.memory_space<semaphore_mem>>)
    %c5_i32 = arith.constant 5 : i32
    %36 = arith.addi %0, %c5_i32 : i32
    %37 = arith.index_cast %36 : i32 to index
    %38 = memref.load %arg1[%37] : memref<16xi32, #tpu.memory_space<smem>>
    %c0_i32_20 = arith.constant 0 : i32
    %c0_i32_21 = arith.constant 0 : i32
    %39 = tpu.memref_slice %arg2[%38, %c0_i32_21] : memref<128x32xf32, #tpu.memory_space<vmem>> -> memref<1x32xf32, #tpu.memory_space<vmem>>
    %c5_i32_22 = arith.constant 5 : i32
    %c0_i32_23 = arith.constant 0 : i32
    %40 = tpu.memref_slice %arg3[%c5_i32_22, %c0_i32_23] : memref<16x32xf32, #tpu.memory_space<vmem>> -> memref<1x32xf32, #tpu.memory_space<vmem>>
    %41 = tpu.memref_slice %arg4[%c0_i32_20] : memref<1x!tpu.dma_semaphore, #tpu.memory_space<semaphore_mem>> -> memref<1x!tpu.dma_semaphore, #tpu.memory_space<semaphore_mem>>
    %42 = tpu.memref_squeeze %41 : memref<1x!tpu.dma_semaphore, #tpu.memory_space<semaphore_mem>> -> memref<!tpu.dma_semaphore, #tpu.memory_space<semaphore_mem>>
    tpu.enqueue_dma source(%39 : memref<1x32xf32, #tpu.memory_space<vmem>>) target(%40 : memref<1x32xf32, #tpu.memory_space<vmem>>) target_semaphore(%42 : memref<!tpu.dma_semaphore, #tpu.memory_space<semaphore_mem>>)
    %c6_i32 = arith.constant 6 : i32
    %43 = arith.addi %0, %c6_i32 : i32
    %44 = arith.index_cast %43 : i32 to index
    %45 = memref.load %arg1[%44] : memref<16xi32, #tpu.memory_space<smem>>
    %c0_i32_24 = arith.constant 0 : i32
    %c0_i32_25 = arith.constant 0 : i32
    %46 = tpu.memref_slice %arg2[%45, %c0_i32_25] : memref<128x32xf32, #tpu.memory_space<vmem>> -> memref<1x32xf32, #tpu.memory_space<vmem>>
    %c6_i32_26 = arith.constant 6 : i32
    %c0_i32_27 = arith.constant 0 : i32
    %47 = tpu.memref_slice %arg3[%c6_i32_26, %c0_i32_27] : memref<16x32xf32, #tpu.memory_space<vmem>> -> memref<1x32xf32, #tpu.memory_space<vmem>>
    %48 = tpu.memref_slice %arg4[%c0_i32_24] : memref<1x!tpu.dma_semaphore, #tpu.memory_space<semaphore_mem>> -> memref<1x!tpu.dma_semaphore, #tpu.memory_space<semaphore_mem>>
    %49 = tpu.memref_squeeze %48 : memref<1x!tpu.dma_semaphore, #tpu.memory_space<semaphore_mem>> -> memref<!tpu.dma_semaphore, #tpu.memory_space<semaphore_mem>>
    tpu.enqueue_dma source(%46 : memref<1x32xf32, #tpu.memory_space<vmem>>) target(%47 : memref<1x32xf32, #tpu.memory_space<vmem>>) target_semaphore(%49 : memref<!tpu.dma_semaphore, #tpu.memory_space<semaphore_mem>>)
    %c7_i32 = arith.constant 7 : i32
    %50 = arith.addi %0, %c7_i32 : i32
    %51 = arith.index_cast %50 : i32 to index
    %52 = memref.load %arg1[%51] : memref<16xi32, #tpu.memory_space<smem>>
    %c0_i32_28 = arith.constant 0 : i32
    %c0_i32_29 = arith.constant 0 : i32
    %53 = tpu.memref_slice %arg2[%52, %c0_i32_29] : memref<128x32xf32, #tpu.memory_space<vmem>> -> memref<1x32xf32, #tpu.memory_space<vmem>>
    %c7_i32_30 = arith.constant 7 : i32
    %c0_i32_31 = arith.constant 0 : i32
    %54 = tpu.memref_slice %arg3[%c7_i32_30, %c0_i32_31] : memref<16x32xf32, #tpu.memory_space<vmem>> -> memref<1x32xf32, #tpu.memory_space<vmem>>
    %55 = tpu.memref_slice %arg4[%c0_i32_28] : memref<1x!tpu.dma_semaphore, #tpu.memory_space<semaphore_mem>> -> memref<1x!tpu.dma_semaphore, #tpu.memory_space<semaphore_mem>>
    %56 = tpu.memref_squeeze %55 : memref<1x!tpu.dma_semaphore, #tpu.memory_space<semaphore_mem>> -> memref<!tpu.dma_semaphore, #tpu.memory_space<semaphore_mem>>
    tpu.enqueue_dma source(%53 : memref<1x32xf32, #tpu.memory_space<vmem>>) target(%54 : memref<1x32xf32, #tpu.memory_space<vmem>>) target_semaphore(%56 : memref<!tpu.dma_semaphore, #tpu.memory_space<semaphore_mem>>)
    %c8_i32 = arith.constant 8 : i32
    %57 = arith.addi %0, %c8_i32 : i32
    %58 = arith.index_cast %57 : i32 to index
    %59 = memref.load %arg1[%58] : memref<16xi32, #tpu.memory_space<smem>>
    %c0_i32_32 = arith.constant 0 : i32
    %c0_i32_33 = arith.constant 0 : i32
    %60 = tpu.memref_slice %arg2[%59, %c0_i32_33] : memref<128x32xf32, #tpu.memory_space<vmem>> -> memref<1x32xf32, #tpu.memory_space<vmem>>
    %c8_i32_34 = arith.constant 8 : i32
    %c0_i32_35 = arith.constant 0 : i32
    %61 = tpu.memref_slice %arg3[%c8_i32_34, %c0_i32_35] : memref<16x32xf32, #tpu.memory_space<vmem>> -> memref<1x32xf32, #tpu.memory_space<vmem>>
    %62 = tpu.memref_slice %arg4[%c0_i32_32] : memref<1x!tpu.dma_semaphore, #tpu.memory_space<semaphore_mem>> -> memref<1x!tpu.dma_semaphore, #tpu.memory_space<semaphore_mem>>
    %63 = tpu.memref_squeeze %62 : memref<1x!tpu.dma_semaphore, #tpu.memory_space<semaphore_mem>> -> memref<!tpu.dma_semaphore, #tpu.memory_space<semaphore_mem>>
    tpu.enqueue_dma source(%60 : memref<1x32xf32, #tpu.memory_space<vmem>>) target(%61 : memref<1x32xf32, #tpu.memory_space<vmem>>) target_semaphore(%63 : memref<!tpu.dma_semaphore, #tpu.memory_space<semaphore_mem>>)
    %c9_i32 = arith.constant 9 : i32
    %64 = arith.addi %0, %c9_i32 : i32
    %65 = arith.index_cast %64 : i32 to index
    %66 = memref.load %arg1[%65] : memref<16xi32, #tpu.memory_space<smem>>
    %c0_i32_36 = arith.constant 0 : i32
    %c0_i32_37 = arith.constant 0 : i32
    %67 = tpu.memref_slice %arg2[%66, %c0_i32_37] : memref<128x32xf32, #tpu.memory_space<vmem>> -> memref<1x32xf32, #tpu.memory_space<vmem>>
    %c9_i32_38 = arith.constant 9 : i32
    %c0_i32_39 = arith.constant 0 : i32
    %68 = tpu.memref_slice %arg3[%c9_i32_38, %c0_i32_39] : memref<16x32xf32, #tpu.memory_space<vmem>> -> memref<1x32xf32, #tpu.memory_space<vmem>>
    %69 = tpu.memref_slice %arg4[%c0_i32_36] : memref<1x!tpu.dma_semaphore, #tpu.memory_space<semaphore_mem>> -> memref<1x!tpu.dma_semaphore, #tpu.memory_space<semaphore_mem>>
    %70 = tpu.memref_squeeze %69 : memref<1x!tpu.dma_semaphore, #tpu.memory_space<semaphore_mem>> -> memref<!tpu.dma_semaphore, #tpu.memory_space<semaphore_mem>>
    tpu.enqueue_dma source(%67 : memref<1x32xf32, #tpu.memory_space<vmem>>) target(%68 : memref<1x32xf32, #tpu.memory_space<vmem>>) target_semaphore(%70 : memref<!tpu.dma_semaphore, #tpu.memory_space<semaphore_mem>>)
    %c10_i32 = arith.constant 10 : i32
    %71 = arith.addi %0, %c10_i32 : i32
    %72 = arith.index_cast %71 : i32 to index
    %73 = memref.load %arg1[%72] : memref<16xi32, #tpu.memory_space<smem>>
    %c0_i32_40 = arith.constant 0 : i32
    %c0_i32_41 = arith.constant 0 : i32
    %74 = tpu.memref_slice %arg2[%73, %c0_i32_41] : memref<128x32xf32, #tpu.memory_space<vmem>> -> memref<1x32xf32, #tpu.memory_space<vmem>>
    %c10_i32_42 = arith.constant 10 : i32
    %c0_i32_43 = arith.constant 0 : i32
    %75 = tpu.memref_slice %arg3[%c10_i32_42, %c0_i32_43] : memref<16x32xf32, #tpu.memory_space<vmem>> -> memref<1x32xf32, #tpu.memory_space<vmem>>
    %76 = tpu.memref_slice %arg4[%c0_i32_40] : memref<1x!tpu.dma_semaphore, #tpu.memory_space<semaphore_mem>> -> memref<1x!tpu.dma_semaphore, #tpu.memory_space<semaphore_mem>>
    %77 = tpu.memref_squeeze %76 : memref<1x!tpu.dma_semaphore, #tpu.memory_space<semaphore_mem>> -> memref<!tpu.dma_semaphore, #tpu.memory_space<semaphore_mem>>
    tpu.enqueue_dma source(%74 : memref<1x32xf32, #tpu.memory_space<vmem>>) target(%75 : memref<1x32xf32, #tpu.memory_space<vmem>>) target_semaphore(%77 : memref<!tpu.dma_semaphore, #tpu.memory_space<semaphore_mem>>)
    %c11_i32 = arith.constant 11 : i32
    %78 = arith.addi %0, %c11_i32 : i32
    %79 = arith.index_cast %78 : i32 to index
    %80 = memref.load %arg1[%79] : memref<16xi32, #tpu.memory_space<smem>>
    %c0_i32_44 = arith.constant 0 : i32
    %c0_i32_45 = arith.constant 0 : i32
    %81 = tpu.memref_slice %arg2[%80, %c0_i32_45] : memref<128x32xf32, #tpu.memory_space<vmem>> -> memref<1x32xf32, #tpu.memory_space<vmem>>
    %c11_i32_46 = arith.constant 11 : i32
    %c0_i32_47 = arith.constant 0 : i32
    %82 = tpu.memref_slice %arg3[%c11_i32_46, %c0_i32_47] : memref<16x32xf32, #tpu.memory_space<vmem>> -> memref<1x32xf32, #tpu.memory_space<vmem>>
    %83 = tpu.memref_slice %arg4[%c0_i32_44] : memref<1x!tpu.dma_semaphore, #tpu.memory_space<semaphore_mem>> -> memref<1x!tpu.dma_semaphore, #tpu.memory_space<semaphore_mem>>
    %84 = tpu.memref_squeeze %83 : memref<1x!tpu.dma_semaphore, #tpu.memory_space<semaphore_mem>> -> memref<!tpu.dma_semaphore, #tpu.memory_space<semaphore_mem>>
    tpu.enqueue_dma source(%81 : memref<1x32xf32, #tpu.memory_space<vmem>>) target(%82 : memref<1x32xf32, #tpu.memory_space<vmem>>) target_semaphore(%84 : memref<!tpu.dma_semaphore, #tpu.memory_space<semaphore_mem>>)
    %c12_i32 = arith.constant 12 : i32
    %85 = arith.addi %0, %c12_i32 : i32
    %86 = arith.index_cast %85 : i32 to index
    %87 = memref.load %arg1[%86] : memref<16xi32, #tpu.memory_space<smem>>
    %c0_i32_48 = arith.constant 0 : i32
    %c0_i32_49 = arith.constant 0 : i32
    %88 = tpu.memref_slice %arg2[%87, %c0_i32_49] : memref<128x32xf32, #tpu.memory_space<vmem>> -> memref<1x32xf32, #tpu.memory_space<vmem>>
    %c12_i32_50 = arith.constant 12 : i32
    %c0_i32_51 = arith.constant 0 : i32
    %89 = tpu.memref_slice %arg3[%c12_i32_50, %c0_i32_51] : memref<16x32xf32, #tpu.memory_space<vmem>> -> memref<1x32xf32, #tpu.memory_space<vmem>>
    %90 = tpu.memref_slice %arg4[%c0_i32_48] : memref<1x!tpu.dma_semaphore, #tpu.memory_space<semaphore_mem>> -> memref<1x!tpu.dma_semaphore, #tpu.memory_space<semaphore_mem>>
    %91 = tpu.memref_squeeze %90 : memref<1x!tpu.dma_semaphore, #tpu.memory_space<semaphore_mem>> -> memref<!tpu.dma_semaphore, #tpu.memory_space<semaphore_mem>>
    tpu.enqueue_dma source(%88 : memref<1x32xf32, #tpu.memory_space<vmem>>) target(%89 : memref<1x32xf32, #tpu.memory_space<vmem>>) target_semaphore(%91 : memref<!tpu.dma_semaphore, #tpu.memory_space<semaphore_mem>>)
    %c13_i32 = arith.constant 13 : i32
    %92 = arith.addi %0, %c13_i32 : i32
    %93 = arith.index_cast %92 : i32 to index
    %94 = memref.load %arg1[%93] : memref<16xi32, #tpu.memory_space<smem>>
    %c0_i32_52 = arith.constant 0 : i32
    %c0_i32_53 = arith.constant 0 : i32
    %95 = tpu.memref_slice %arg2[%94, %c0_i32_53] : memref<128x32xf32, #tpu.memory_space<vmem>> -> memref<1x32xf32, #tpu.memory_space<vmem>>
    %c13_i32_54 = arith.constant 13 : i32
    %c0_i32_55 = arith.constant 0 : i32
    %96 = tpu.memref_slice %arg3[%c13_i32_54, %c0_i32_55] : memref<16x32xf32, #tpu.memory_space<vmem>> -> memref<1x32xf32, #tpu.memory_space<vmem>>
    %97 = tpu.memref_slice %arg4[%c0_i32_52] : memref<1x!tpu.dma_semaphore, #tpu.memory_space<semaphore_mem>> -> memref<1x!tpu.dma_semaphore, #tpu.memory_space<semaphore_mem>>
    %98 = tpu.memref_squeeze %97 : memref<1x!tpu.dma_semaphore, #tpu.memory_space<semaphore_mem>> -> memref<!tpu.dma_semaphore, #tpu.memory_space<semaphore_mem>>
    tpu.enqueue_dma source(%95 : memref<1x32xf32, #tpu.memory_space<vmem>>) target(%96 : memref<1x32xf32, #tpu.memory_space<vmem>>) target_semaphore(%98 : memref<!tpu.dma_semaphore, #tpu.memory_space<semaphore_mem>>)
    %c14_i32 = arith.constant 14 : i32
    %99 = arith.addi %0, %c14_i32 : i32
    %100 = arith.index_cast %99 : i32 to index
    %101 = memref.load %arg1[%100] : memref<16xi32, #tpu.memory_space<smem>>
    %c0_i32_56 = arith.constant 0 : i32
    %c0_i32_57 = arith.constant 0 : i32
    %102 = tpu.memref_slice %arg2[%101, %c0_i32_57] : memref<128x32xf32, #tpu.memory_space<vmem>> -> memref<1x32xf32, #tpu.memory_space<vmem>>
    %c14_i32_58 = arith.constant 14 : i32
    %c0_i32_59 = arith.constant 0 : i32
    %103 = tpu.memref_slice %arg3[%c14_i32_58, %c0_i32_59] : memref<16x32xf32, #tpu.memory_space<vmem>> -> memref<1x32xf32, #tpu.memory_space<vmem>>
    %104 = tpu.memref_slice %arg4[%c0_i32_56] : memref<1x!tpu.dma_semaphore, #tpu.memory_space<semaphore_mem>> -> memref<1x!tpu.dma_semaphore, #tpu.memory_space<semaphore_mem>>
    %105 = tpu.memref_squeeze %104 : memref<1x!tpu.dma_semaphore, #tpu.memory_space<semaphore_mem>> -> memref<!tpu.dma_semaphore, #tpu.memory_space<semaphore_mem>>
    tpu.enqueue_dma source(%102 : memref<1x32xf32, #tpu.memory_space<vmem>>) target(%103 : memref<1x32xf32, #tpu.memory_space<vmem>>) target_semaphore(%105 : memref<!tpu.dma_semaphore, #tpu.memory_space<semaphore_mem>>)
    %c15_i32 = arith.constant 15 : i32
    %106 = arith.addi %0, %c15_i32 : i32
    %107 = arith.index_cast %106 : i32 to index
    %108 = memref.load %arg1[%107] : memref<16xi32, #tpu.memory_space<smem>>
    %c0_i32_60 = arith.constant 0 : i32
    %c0_i32_61 = arith.constant 0 : i32
    %109 = tpu.memref_slice %arg2[%108, %c0_i32_61] : memref<128x32xf32, #tpu.memory_space<vmem>> -> memref<1x32xf32, #tpu.memory_space<vmem>>
    %c15_i32_62 = arith.constant 15 : i32
    %c0_i32_63 = arith.constant 0 : i32
    %110 = tpu.memref_slice %arg3[%c15_i32_62, %c0_i32_63] : memref<16x32xf32, #tpu.memory_space<vmem>> -> memref<1x32xf32, #tpu.memory_space<vmem>>
    %111 = tpu.memref_slice %arg4[%c0_i32_60] : memref<1x!tpu.dma_semaphore, #tpu.memory_space<semaphore_mem>> -> memref<1x!tpu.dma_semaphore, #tpu.memory_space<semaphore_mem>>
    %112 = tpu.memref_squeeze %111 : memref<1x!tpu.dma_semaphore, #tpu.memory_space<semaphore_mem>> -> memref<!tpu.dma_semaphore, #tpu.memory_space<semaphore_mem>>
    tpu.enqueue_dma source(%109 : memref<1x32xf32, #tpu.memory_space<vmem>>) target(%110 : memref<1x32xf32, #tpu.memory_space<vmem>>) target_semaphore(%112 : memref<!tpu.dma_semaphore, #tpu.memory_space<semaphore_mem>>)
    %c0_i32_64 = arith.constant 0 : i32
    %113 = tpu.memref_slice %arg4[%c0_i32_64] : memref<1x!tpu.dma_semaphore, #tpu.memory_space<semaphore_mem>> -> memref<1x!tpu.dma_semaphore, #tpu.memory_space<semaphore_mem>>
    %114 = tpu.memref_squeeze %113 : memref<1x!tpu.dma_semaphore, #tpu.memory_space<semaphore_mem>> -> memref<!tpu.dma_semaphore, #tpu.memory_space<semaphore_mem>>
    tpu.wait_dma2 semaphore(%114 : memref<!tpu.dma_semaphore, #tpu.memory_space<semaphore_mem>>) src(%arg3 : memref<16x32xf32, #tpu.memory_space<vmem>>) dst(%arg3 : memref<16x32xf32, #tpu.memory_space<vmem>>)
    return
  }
  func.func @transform_0(%arg0: i32, %arg1: memref<16xi32, #tpu.memory_space<smem>>) -> (i32, i32) {
    %c0_i32 = arith.constant 0 : i32
    %c0_i32_0 = arith.constant 0 : i32
    %c0_i32_1 = arith.constant 0 : i32
    return %c0_i32, %c0_i32_0 : i32, i32
  }
  func.func @transform_1(%arg0: i32, %arg1: memref<16xi32, #tpu.memory_space<smem>>) -> (i32, i32) {
    %c0_i32 = arith.constant 0 : i32
    %c0_i32_0 = arith.constant 0 : i32
    return %arg0, %c0_i32 : i32, i32
  }
}

</mosaic_0001>

<bundles_post_ra>
// kernel: tpu_custom_call.1
= control target key start
LH: loop header
LB: loop body
LE: loop exit
PB: predicated region body
PF: predicated region fallthrough
CT: control target
= control target key end

     0   :  { %s1141_s0 = inlined_call_operand.vmem [shape: s32[16], index: 0, kind: input, shape index: {}]   ;;  %s1142_s1 = inlined_call_operand.vmem [shape: f32[128,32], index: 1, kind: input, shape index: {}]   ;;  %s1143_s2 = inlined_call_operand.hbm [shape: f32[16,32], index: 2, kind: output, shape index: {}]  }
   0x1   :  { %s7_s11 = sshll.u32 %s1141_s0, 4  ;;  %s8_s11 = int_to_ptr.vmem [resolvable:$true] %s7_s11 }
   0x2   :  { %s1019_s12 = scalar_lea.vmem %s8_s11, 16  ;;  %p1024_p1 = scmp.lt.s32.totalorder %s8_s11, %s8_s11 }
   0x3   :  { %p1020_p0 = scmp.ne.s32.totalorder %s8_s11, %s1019_s12  ;;  %p1025_p2 = scmp.lt.s32.totalorder %s1019_s12, %s1019_s12 }
   0x5   :  { %p1026_p3 = por %p1025_p2, %p1024_p1 }
   0x7   :  { %p1027_p4 = pnand %p1026_p3, %p1020_p0 }
   0x9   :  { %1030 = shalt.err (!%p1027_p4)  }
   0xa   :  { %s1059_s13 = smov [#allocation4]  }
   0xb   :  { %10 = dma.vmem_to_smem %s8_s11, 16, %s1059_s13, [#allocation3] }
   0xc   :  { %1053 = dma.done.wait [#allocation3], 16 }
   0xd   :  { %1054 = vsyncadd [#allocation3], 4294967280 }
   0xe   :  { %12 = sfence }
   0xf   :  { %13 = vsyncpa [#allocation6], 0  ;;  %s17_s14 = sld [smem:[#allocation4]] }
  0x15   :  { %s18_s17 = scalar_lea.vmem %s1142_s1, %s17_s14 }
  0x16   :  { %v36_v0 = vld [vmem:[%s18_s17] sm:$0x1] }
  0x17   :  { %37 = vst [vmem:[#allocation5] sm:$0x1] %v36_v0 }
  0x18   :  { %62 = vsyncadd [#allocation2], 16  ;;  %s999_s0 = sld [smem:[#allocation4 + $0x1]] }
  0x1e   :  { %s65_s20 = scalar_lea.vmem %s1142_s1, %s999_s0 }
  0x1f   :  { %v84_v1 = vld [vmem:[%s65_s20] sm:$0x1] }
  0x20   :  { %85 = vst [vmem:[#allocation5 + $0x1] sm:$0x1] %v84_v1 }
  0x21   :  { %110 = vsyncadd [#allocation2], 16  ;;  %s1000_s21 = sld [smem:[#allocation4 + $0x2]] }
  0x27   :  { %s113_s24 = scalar_lea.vmem %s1142_s1, %s1000_s21 }
  0x28   :  { %v132_v2 = vld [vmem:[%s113_s24] sm:$0x1] }
  0x29   :  { %133 = vst [vmem:[#allocation5 + $0x2] sm:$0x1] %v132_v2 }
  0x2a   :  { %158 = vsyncadd [#allocation2], 16  ;;  %s1001_s25 = sld [smem:[#allocation4 + $0x3]] }
  0x30   :  { %s161_s28 = scalar_lea.vmem %s1142_s1, %s1001_s25 }
  0x31   :  { %v180_v3 = vld [vmem:[%s161_s28] sm:$0x1] }
  0x32   :  { %181 = vst [vmem:[#allocation5 + $0x3] sm:$0x1] %v180_v3 }
  0x33   :  { %206 = vsyncadd [#allocation2], 16  ;;  %s1002_s29 = sld [smem:[#allocation4 + $0x4]] }
  0x39   :  { %s209_s4 = scalar_lea.vmem %s1142_s1, %s1002_s29 }
  0x3a   :  { %v228_v4 = vld [vmem:[%s209_s4] sm:$0x1] }
  0x3b   :  { %229 = vst [vmem:[#allocation5 + $0x4] sm:$0x1] %v228_v4 }
  0x3c   :  { %254 = vsyncadd [#allocation2], 16  ;;  %s1003_s5 = sld [smem:[#allocation4 + $0x5]] }
  0x42   :  { %s257_s8 = scalar_lea.vmem %s1142_s1, %s1003_s5 }
  0x43   :  { %v276_v5 = vld [vmem:[%s257_s8] sm:$0x1] }
  0x44   :  { %277 = vst [vmem:[#allocation5 + $0x5] sm:$0x1] %v276_v5 }
  0x45   :  { %302 = vsyncadd [#allocation2], 16  ;;  %s1004_s9 = sld [smem:[#allocation4 + $0x6]] }
  0x4b   :  { %s305_s12 = scalar_lea.vmem %s1142_s1, %s1004_s9 }
  0x4c   :  { %v324_v6 = vld [vmem:[%s305_s12] sm:$0x1] }
  0x4d   :  { %325 = vst [vmem:[#allocation5 + $0x6] sm:$0x1] %v324_v6 }
  0x4e   :  { %350 = vsyncadd [#allocation2], 16  ;;  %s1005_s13 = sld [smem:[#allocation4 + $0x7]] }
  0x54   :  { %s353_s16 = scalar_lea.vmem %s1142_s1, %s1005_s13 }
  0x55   :  { %v372_v7 = vld [vmem:[%s353_s16] sm:$0x1] }
  0x56   :  { %373 = vst [vmem:[#allocation5 + $0x7] sm:$0x1] %v372_v7 }
  0x57   :  { %398 = vsyncadd [#allocation2], 16  ;;  %s1006_s17 = sld [smem:[#allocation4 + $0x8]] }
  0x5d   :  { %s401_s19 = scalar_lea.vmem %s1142_s1, %s1006_s17 }
  0x5e   :  { %v420_v8 = vld [vmem:[%s401_s19] sm:$0x1] }
  0x5f   :  { %421 = vst [vmem:[#allocation5 + $0x8] sm:$0x1] %v420_v8 }
  0x60   :  { %446 = vsyncadd [#allocation2], 16  ;;  %s1007_s20 = sld [smem:[#allocation4 + $0x9]] }
  0x66   :  { %s449_s23 = scalar_lea.vmem %s1142_s1, %s1007_s20 }
  0x67   :  { %v468_v9 = vld [vmem:[%s449_s23] sm:$0x1] }
  0x68   :  { %469 = vst [vmem:[#allocation5 + $0x9] sm:$0x1] %v468_v9 }
  0x69   :  { %494 = vsyncadd [#allocation2], 16  ;;  %s1008_s24 = sld [smem:[#allocation4 + $0xa]] }
  0x6f   :  { %s497_s27 = scalar_lea.vmem %s1142_s1, %s1008_s24 }
  0x70   :  { %v516_v10 = vld [vmem:[%s497_s27] sm:$0x1] }
  0x71   :  { %517 = vst [vmem:[#allocation5 + $0xa] sm:$0x1] %v516_v10 }
  0x72   :  { %542 = vsyncadd [#allocation2], 16  ;;  %s1009_s28 = sld [smem:[#allocation4 + $0xb]] }
  0x78   :  { %s545_s3 = scalar_lea.vmem %s1142_s1, %s1009_s28 }
  0x79   :  { %v564_v11 = vld [vmem:[%s545_s3] sm:$0x1] }
  0x7a   :  { %565 = vst [vmem:[#allocation5 + $0xb] sm:$0x1] %v564_v11 }
  0x7b   :  { %590 = vsyncadd [#allocation2], 16  ;;  %s1010_s4 = sld [smem:[#allocation4 + $0xc]] }
  0x81   :  { %s593_s7 = scalar_lea.vmem %s1142_s1, %s1010_s4 }
  0x82   :  { %v612_v12 = vld [vmem:[%s593_s7] sm:$0x1] }
  0x83   :  { %613 = vst [vmem:[#allocation5 + $0xc] sm:$0x1] %v612_v12 }
  0x84   :  { %638 = vsyncadd [#allocation2], 16  ;;  %s1011_s8 = sld [smem:[#allocation4 + $0xd]] }
  0x8a   :  { %s641_s11 = scalar_lea.vmem %s1142_s1, %s1011_s8 }
  0x8b   :  { %v660_v13 = vld [vmem:[%s641_s11] sm:$0x1] }
  0x8c   :  { %661 = vst [vmem:[#allocation5 + $0xd] sm:$0x1] %v660_v13 }
  0x8d   :  { %686 = vsyncadd [#allocation2], 16  ;;  %s1012_s12 = sld [smem:[#allocation4 + $0xe]] }
  0x93   :  { %s689_s15 = scalar_lea.vmem %s1142_s1, %s1012_s12 }
  0x94   :  { %v708_v14 = vld [vmem:[%s689_s15] sm:$0x1] }
  0x95   :  { %709 = vst [vmem:[#allocation5 + $0xe] sm:$0x1] %v708_v14 }
  0x96   :  { %734 = vsyncadd [#allocation2], 16  ;;  %s1013_s16 = sld [smem:[#allocation4 + $0xf]] }
  0x9c   :  { %s737_s18 = scalar_lea.vmem %s1142_s1, %s1013_s16 }
  0x9d   :  { %v756_v15 = vld [vmem:[%s737_s18] sm:$0x1] }
  0x9e   :  { %757 = vst [vmem:[#allocation5 + $0xf] sm:$0x1] %v756_v15 }
  0x9f   :  { %782 = vsyncadd [#allocation2], 16 }
  0xa0   :  { %1055 = dma.done.wait [#allocation2], 256 }
  0xa1   :  { %1056 = vsyncadd [#allocation2], 4294967040  ;;  %s1060_s19 = smov [#allocation5]  }
  0xa2   :  { %s791_s20 = sshll.u32 %s1060_s19, 4  ;;  %s792_s20 = int_to_ptr.vmem [resolvable:$true] %s791_s20 }
  0xa3   :  { %s1031_s21 = scalar_lea.vmem %s792_s20, 256  ;;  %p1036_p6 = scmp.lt.s32.totalorder %s792_s20, %s792_s20 }
  0xa4   :  { %p1032_p5 = scmp.ne.s32.totalorder %s792_s20, %s1031_s21  ;;  %p1037_p7 = scmp.lt.s32.totalorder %s1031_s21, %s1031_s21 }
  0xa6   :  { %p1038_p8 = por %p1037_p7, %p1036_p6 }
  0xa8   :  { %p1039_p9 = pnand %p1038_p8, %p1032_p5 }
  0xaa   :  { %1042 = shalt.err (!%p1039_p9)
}
  0xab   :  { %s1043_s24 = scalar_lea.hbm %s1143_s2, 256 }
  0xac   :  { %p1044_p10 = scmp.ne.s32.totalorder %s1143_s2, %s1043_s24  ;;  %p1047_p11 = scmp.lt.u32.totalorder %s1043_s24, %s1143_s2 }
  0xae   :  { %p1049_p12 = pnand %p1047_p11, %p1044_p10 }
  0xb0   :  { %1052 = shalt.err (!%p1049_p12)
}
  0xb1   :  { %s1061_s28 = smov 128   ;;  %s1062_s29 = smov 8  }
  0xb2   :  { %797 = dma.vmem_to_hbm [thread:$0]  %s792_s20, 256, %s1143_s2, [#allocation6], %s1061_s28, %s1061_s28, %s1062_s29  }
  0xb3   :  { %1057 = dma.done.wait [#allocation6], 256  }
  0xb4   :  { %1058 = vsyncadd [#allocation6], 4294967040 }
  0xb5   :  { %801 = vsyncpa [#allocation6], 1 }
  0xb6   :  { %802 = vsyncmov [#allocation2] }
  0xb9   :  { %s803_s4 = vpop.sfrf %802 }
  0xba   :  { %p1014_p13 = scmp.ne.s32.totalorder %s803_s4, 0 }
  0xbc   :  { %807 = shalt.err (%p1014_p13)  }

</bundles_post_ra>
